<compile_context>
chip_gen: v7x
topology: tpu7x:2x2x1
jax: 0.10.0
libtpu: 0.0.40
codegen_flags: <defaults>
</compile_context>

<pallas_src>
import numpy as np
import jax
import jax.numpy as jnp
from jax import lax
from jax.experimental import pallas as pl
from jax.experimental.pallas import tpu as pltpu


# ----------------------------------------------------------------------------
# librosa.filters.mel equivalent (Slaney mel scale, slaney norm) -- numpy glue
# ----------------------------------------------------------------------------
def _hz_to_mel(freq, htk=False):
    freq = np.asarray(freq, dtype=np.float64)
    if htk:
        return 2595.0 * np.log10(1.0 + freq / 700.0)
    f_min, f_sp = 0.0, 200.0 / 3
    mels = (freq - f_min) / f_sp
    min_log_hz = 1000.0
    min_log_mel = (min_log_hz - f_min) / f_sp
    logstep = np.log(6.4) / 27.0
    return np.where(
        freq >= min_log_hz,
        min_log_mel + np.log(np.maximum(freq, 1e-12) / min_log_hz) / logstep,
        mels,
    )


def _mel_to_hz(mels, htk=False):
    mels = np.asarray(mels, dtype=np.float64)
    if htk:
        return 700.0 * (10.0 ** (mels / 2595.0) - 1.0)
    f_min, f_sp = 0.0, 200.0 / 3
    freqs = f_min + f_sp * mels
    min_log_hz = 1000.0
    min_log_mel = (min_log_hz - f_min) / f_sp
    logstep = np.log(6.4) / 27.0
    return np.where(
        mels >= min_log_mel,
        min_log_hz * np.exp(logstep * (mels - min_log_mel)),
        freqs,
    )


def mel_filterbank(sr, n_fft, n_mels, fmin, fmax, htk=False):
    """Returns (n_mels, n_fft//2 + 1) Slaney-normalized mel filterbank."""
    n_freq = n_fft // 2 + 1
    fftfreqs = np.linspace(0.0, sr / 2.0, n_freq)
    min_mel = _hz_to_mel(fmin, htk)
    max_mel = _hz_to_mel(fmax, htk)
    mels = np.linspace(min_mel, max_mel, n_mels + 2)
    mel_f = _mel_to_hz(mels, htk)
    fdiff = np.diff(mel_f)
    ramps = mel_f[:, None] - fftfreqs[None, :]
    lower = -ramps[:-2] / fdiff[:-1, None]
    upper = ramps[2:] / fdiff[1:, None]
    weights = np.maximum(0.0, np.minimum(lower, upper))
    enorm = 2.0 / (mel_f[2 : n_mels + 2] - mel_f[:n_mels])
    weights = weights * enorm[:, None]
    return weights.astype(np.float32)


def _ceil_to(x, m):
    return ((x + m - 1) // m) * m


# ----------------------------------------------------------------------------
# Pallas-backed FBank forward
# ----------------------------------------------------------------------------
def fbank_pallas(speech, *, fs, n_fft, win_length, hop_length, n_mels,
                 fmin=None, fmax=None, htk=False, log_base=None, tm=512):
    """speech: (B, L) float32 -> (logmel (B, T, n_mels) float32, None)."""
    B, L = speech.shape
    n_freq = n_fft // 2 + 1
    fmin = 0.0 if fmin is None else fmin
    fmax = fs / 2.0 if fmax is None else fmax

    # Lane-padded widths (multiples of 128) for dense, unmasked stores.
    Fpad = _ceil_to(n_freq, 128)
    Mpad = _ceil_to(n_mels, 128)
    SUB = 64                     # in-kernel row sub-tile (keeps ri/power small)

    # --- glue: hann window (periodic, like torch.hann_window default) -------
    n = np.arange(win_length, dtype=np.float64)
    win = 0.5 * (1.0 - np.cos(2.0 * np.pi * n / win_length))
    left = (n_fft - win_length) // 2          # torch.stft centers the window
    window = np.zeros((n_fft,), dtype=np.float64)
    window[left:left + win_length] = win

    # --- glue: center=True reflect pad + strided framing (bf16) --------------
    # conv_general_dilated_patches replaces the element-granularity gather:
    # overlapping windows are extracted with a strided identity conv, which is
    # far cheaper on TPU than x[:, frame_idx].
    pad = n_fft // 2
    x = jnp.pad(speech.astype(jnp.bfloat16), ((0, 0), (pad, pad)), mode="reflect")
    Lp = L + 2 * pad
    T = 1 + (Lp - n_fft) // hop_length
    patches = lax.conv_general_dilated_patches(
        x[:, None, :],                        # (B, 1, Lp)   NCW
        filter_shape=(n_fft,),
        window_strides=(hop_length,),
        padding="VALID")                      # (B, n_fft, T)
    frames = jnp.moveaxis(patches, 1, 2).reshape(B * T, n_fft)   # (B*T, n_fft) bf16

    # --- glue: fused window-folded real-DFT matrix [cos | sin], lane padded --
    k = np.arange(n_freq)[None, :]
    nn = np.arange(n_fft)[:, None]
    ang = 2.0 * np.pi * k * nn / n_fft
    dft = np.zeros((n_fft, 2 * Fpad), dtype=np.float32)
    dft[:, :n_freq] = (window[:, None] * np.cos(ang)).astype(np.float32)
    dft[:, Fpad:Fpad + n_freq] = (window[:, None] * (-np.sin(ang))).astype(np.float32)
    dft_bf16 = jnp.asarray(dft, dtype=jnp.bfloat16)               # (n_fft, 2*Fpad)

    mel_t = mel_filterbank(fs, n_fft, n_mels, fmin, fmax, htk).T  # (F, n_mels)
    melmat_pad = np.zeros((Fpad, Mpad), dtype=np.float32)
    melmat_pad[:n_freq, :n_mels] = mel_t
    mel_bf16 = jnp.asarray(melmat_pad, dtype=jnp.bfloat16)        # bf16 MXU matmul

    # natural log by default; other bases are a scalar scale on the log
    log_scale = 1.0 if log_base is None else float(1.0 / np.log(log_base))

    # --- adaptive row tile: no forced 2*tm padding for tiny inputs -----------
    N = B * T
    tm_eff = max(SUB, min(int(tm), _ceil_to(N, SUB)))
    tm_eff = _ceil_to(tm_eff, SUB)
    Npad = _ceil_to(N, tm_eff)
    frames_p = jnp.pad(frames, ((0, Npad - N), (0, 0)))
    # TODO(synk): on v7x (2 TensorCores) with large N, cap tm_eff so the
    # "parallel" grid axis keeps >=2 steps per core for DMA overlap.

    # --- kernel: DFT matmul -> power -> mel matmul -> log, 64-row sub-tiles --
    def _fbank_kernel(frames_ref, dft_ref, mel_ref, out_ref):
        dft_m = dft_ref[...]            # (n_fft, 2*Fpad) bf16, constant block
        mel_m = mel_ref[...]            # (Fpad, Mpad)   bf16, constant block

        def body(c, carry):
            r0 = pl.multiple_of(c * SUB, SUB)
            f = frames_ref[pl.ds(r0, SUB), :]                          # (SUB, n_fft)
            ri = jnp.dot(f, dft_m,
                         preferred_element_type=jnp.float32)           # (SUB, 2*Fpad)
            real = ri[:, :Fpad]
            imag = ri[:, Fpad:]
            power = real * real + imag * imag                          # (SUB, Fpad) f32
            mel = jnp.dot(power.astype(jnp.bfloat16), mel_m,
                          preferred_element_type=jnp.float32)          # (SUB, Mpad)
            logmel = jnp.log(jnp.maximum(mel, 1e-10))
            if log_scale != 1.0:
                logmel = logmel * log_scale
            out_ref[pl.ds(r0, SUB), :] = logmel.astype(out_ref.dtype)  # bf16 store
            return carry

        lax.fori_loop(0, tm_eff // SUB, body, 0, unroll=True)

    # advisory cost estimate, kept consistent with bf16 inputs/output
    flops = (2 * Npad * n_fft * (2 * Fpad)        # fused DFT matmul
             + 3 * Npad * Fpad                    # power
             + 2 * Npad * Fpad * Mpad)            # mel matmul
    bytes_accessed = (Npad * n_fft * 2            # frames bf16
                      + n_fft * 2 * Fpad * 2      # dft bf16
                      + Fpad * Mpad * 2           # melmat bf16
                      + Npad * Mpad * 2)          # output bf16
    cost = pl.CostEstimate(flops=flops, transcendentals=Npad * Mpad,
                           bytes_accessed=bytes_accessed)

    # Explicit VMEM budget: frames/out double-buffered, constants worst-case
    # double-buffered, plus f32 ri/power sub-tile intermediates.  Capped at
    # 64 MiB (v7x physical VMEM); v5e/v6e have 128 MiB so this is always safe.
    vmem_need = (2 * tm_eff * n_fft * 2
                 + 2 * n_fft * (2 * Fpad) * 2
                 + 2 * Fpad * Mpad * 2
                 + 2 * tm_eff * Mpad * 2
                 + 4 * SUB * (2 * Fpad) * 4)
    vmem_limit = int(min(64 * 1024 * 1024, max(2 * vmem_need, 16 * 1024 * 1024)))

    def _call(single_buffer_consts):
        const_kw = {}
        if single_buffer_consts:
            # dft/melmat blocks never change (index_map == (0,0)); one buffer.
            const_kw = dict(pipeline_mode=pl.Buffered(1))
        return pl.pallas_call(
            _fbank_kernel,
            out_shape=jax.ShapeDtypeStruct((Npad, Mpad), jnp.bfloat16),
            grid_spec=pltpu.PrefetchScalarGridSpec(
                num_scalar_prefetch=0,
                grid=(Npad // tm_eff,),
                in_specs=[
                    pl.BlockSpec((tm_eff, n_fft), lambda i: (i, 0)),
                    pl.BlockSpec((n_fft, 2 * Fpad), lambda i: (0, 0), **const_kw),
                    pl.BlockSpec((Fpad, Mpad), lambda i: (0, 0), **const_kw),
                ],
                out_specs=pl.BlockSpec((tm_eff, Mpad), lambda i: (i, 0)),
            ),
            compiler_params=pltpu.CompilerParams(
                dimension_semantics=("parallel",),
                vmem_limit_bytes=vmem_limit),
            cost_estimate=cost,
        )(frames_p, dft_bf16, mel_bf16)

    try:
        out = _call(True)
    except Exception:
        # TODO(synk): pl.Buffered(1) single-buffering unsupported on this jax
        # version; fall back to default double-buffered constant blocks.
        out = _call(False)

    logmel = out[:N, :n_mels].astype(jnp.float32).reshape(B, T, n_mels)
    return logmel, None


# ----------------------------------------------------------------------------
# Pure-JAX f32 reference of the same math (unfused, for a sanity check)
# ----------------------------------------------------------------------------
def _reference(speech, *, fs, n_fft, win_length, hop_length, n_mels,
               fmin=None, fmax=None, htk=False):
    B, L = speech.shape
    n_freq = n_fft // 2 + 1
    fmin = 0.0 if fmin is None else fmin
    fmax = fs / 2.0 if fmax is None else fmax
    n = np.arange(win_length, dtype=np.float64)
    win = 0.5 * (1.0 - np.cos(2.0 * np.pi * n / win_length))
    left = (n_fft - win_length) // 2
    window = np.zeros((n_fft,), dtype=np.float32)
    window[left:left + win_length] = win.astype(np.float32)
    pad = n_fft // 2
    x = jnp.pad(speech, ((0, 0), (pad, pad)), mode="reflect")
    T = 1 + (L + 2 * pad - n_fft) // hop_length
    idx = np.arange(T)[:, None] * hop_length + np.arange(n_fft)[None, :]
    frames = x[:, idx] * jnp.asarray(window)[None, None, :]
    k = np.arange(n_freq)[None, :]
    nn = np.arange(n_fft)[:, None]
    ang = 2.0 * np.pi * k * nn / n_fft
    cos_mat = jnp.asarray(np.cos(ang), dtype=jnp.float32)
    sin_mat = jnp.asarray(-np.sin(ang), dtype=jnp.float32)
    real = frames @ cos_mat
    imag = frames @ sin_mat
    power = real * real + imag * imag
    melmat_t = jnp.asarray(mel_filterbank(fs, n_fft, n_mels, fmin, fmax, htk).T)
    mel = jnp.maximum(power @ melmat_t, 1e-10)
    return jnp.log(mel)


if __name__ == "__main__":
    # Small shapes consistent with the module's forward: speech (B, L).
    fs = 4000
    n_fft = 128
    win_length = 100
    hop_length = 32
    n_mels = 16

    key = jax.random.PRNGKey(0)
    B, L = 2, 800
    speech = jax.random.normal(key, (B, L), dtype=jnp.float32)

    logmel, stft_len = fbank_pallas(
        speech, fs=fs, n_fft=n_fft, win_length=win_length,
        hop_length=hop_length, n_mels=n_mels)
    logmel = jax.block_until_ready(logmel)

    ref = _reference(
        speech, fs=fs, n_fft=n_fft, win_length=win_length,
        hop_length=hop_length, n_mels=n_mels)
    ref = jax.block_until_ready(ref)

    assert logmel.shape == (B, 1 + L // hop_length, n_mels), logmel.shape
    assert stft_len is None
    # bf16 frames / DFT / mel matmul / output keep log-mel error ~1e-2 abs.
    np.testing.assert_allclose(np.asarray(logmel), np.asarray(ref),
                               rtol=1e-1, atol=1e-1)
    print("KERNEL_OK")
</pallas_src>

<mosaic_0001>
module attributes {stable_mosaic.version = 11 : i64} {
  func.func @_fbank_kernel(%arg0: i32, %arg1: memref<64x128xbf16, #tpu.memory_space<vmem>>, %arg2: memref<128x256xbf16, #tpu.memory_space<vmem>>, %arg3: memref<128x128xbf16, #tpu.memory_space<vmem>>, %arg4: memref<64x128xbf16, #tpu.memory_space<vmem>>) attributes {dimension_semantics = [#tpu.dimension_semantics<parallel>], iteration_bounds = array<i64: 1>, scalar_prefetch = 0 : i64, scratch_operands = 0 : i64, tpu.core_type = #tpu.core_type<tc>, window_params = [{transform_indices = @transform_0, window_bounds = array<i64: 64, 128>}, {pipeline_mode = #tpu.pipeline_mode<synchronous>, transform_indices = @transform_1, window_bounds = array<i64: 128, 256>}, {pipeline_mode = #tpu.pipeline_mode<synchronous>, transform_indices = @transform_2, window_bounds = array<i64: 128, 128>}, {transform_indices = @transform_3, window_bounds = array<i64: 64, 128>}]} {
    %c0 = arith.constant 0 : index
    %c0_0 = arith.constant 0 : index
    %0 = vector.load %arg2[%c0, %c0_0] : memref<128x256xbf16, #tpu.memory_space<vmem>>, vector<128x256xbf16>
    %c0_1 = arith.constant 0 : index
    %c0_2 = arith.constant 0 : index
    %1 = vector.load %arg3[%c0_1, %c0_2] : memref<128x128xbf16, #tpu.memory_space<vmem>>, vector<128x128xbf16>
    %c0_i32 = arith.constant 0 : i32
    %c64_i32 = arith.constant 64 : i32
    %2 = arith.muli %c0_i32, %c64_i32 : i32
    %3 = tpu.assume_multiple %2, 64 : i32
    %4 = arith.index_cast %3 : i32 to index
    %c0_3 = arith.constant 0 : index
    %5 = vector.load %arg1[%4, %c0_3] : memref<64x128xbf16, #tpu.memory_space<vmem>>, vector<64x128xbf16>
    %cst = arith.constant dense<0.000000e+00> : vector<64x256xf32>
    %6 = tpu.matmul %5, %0, %cst {dimension_numbers = #tpu.dot_dimension_numbers<[1], [0], [0], [1], [0, 0, 1, 1], [], []>} : vector<64x128xbf16>, vector<128x256xbf16>, vector<64x256xf32> -> vector<64x256xf32>
    %7 = vector.extract_strided_slice %6 {offsets = [0, 0], sizes = [64, 128], strides = [1, 1]} : vector<64x256xf32> to vector<64x128xf32>
    %8 = vector.extract_strided_slice %6 {offsets = [0, 128], sizes = [64, 128], strides = [1, 1]} : vector<64x256xf32> to vector<64x128xf32>
    %9 = arith.mulf %7, %7 : vector<64x128xf32>
    %10 = arith.mulf %8, %8 : vector<64x128xf32>
    %11 = arith.addf %9, %10 : vector<64x128xf32>
    %12 = arith.truncf %11 : vector<64x128xf32> to vector<64x128xbf16>
    %cst_4 = arith.constant dense<0.000000e+00> : vector<64x128xf32>
    %13 = tpu.matmul %12, %1, %cst_4 {dimension_numbers = #tpu.dot_dimension_numbers<[1], [0], [0], [1], [0, 0, 1, 1], [], []>} : vector<64x128xbf16>, vector<128x128xbf16>, vector<64x128xf32> -> vector<64x128xf32>
    %cst_5 = arith.constant 1.000000e-10 : f32
    %14 = vector.broadcast %cst_5 : f32 to vector<64x128xf32>
    %15 = arith.maximumf %13, %14 : vector<64x128xf32>
    %16 = math.log %15 : vector<64x128xf32>
    %17 = arith.truncf %16 : vector<64x128xf32> to vector<64x128xbf16>
    %18 = arith.index_cast %3 : i32 to index
    %c0_6 = arith.constant 0 : index
    %19 = vector.load %arg4[%18, %c0_6] : memref<64x128xbf16, #tpu.memory_space<vmem>>, vector<64x128xbf16>
    tpu.vector_store %arg4[%18, %c0_6], %17 {strides = array<i32>} : memref<64x128xbf16, #tpu.memory_space<vmem>>, vector<64x128xbf16>,
    %c1_i32 = arith.constant 1 : i32
    return
  }
  func.func @transform_0(%arg0: i32) -> (i32, i32) {
    %c0_i32 = arith.constant 0 : i32
    %c0_i32_0 = arith.constant 0 : i32
    return %arg0, %c0_i32 : i32, i32
  }
  func.func @transform_1(%arg0: i32) -> (i32, i32) {
    %c0_i32 = arith.constant 0 : i32
    %c0_i32_0 = arith.constant 0 : i32
    %c0_i32_1 = arith.constant 0 : i32
    return %c0_i32, %c0_i32_0 : i32, i32
  }
  func.func @transform_2(%arg0: i32) -> (i32, i32) {
    %c0_i32 = arith.constant 0 : i32
    %c0_i32_0 = arith.constant 0 : i32
    %c0_i32_1 = arith.constant 0 : i32
    return %c0_i32, %c0_i32_0 : i32, i32
  }
  func.func @transform_3(%arg0: i32) -> (i32, i32) {
    %c0_i32 = arith.constant 0 : i32
    %c0_i32_0 = arith.constant 0 : i32
    return %arg0, %c0_i32 : i32, i32
  }
}

module attributes {stable_mosaic.version = 11 : i64} {
  func.func @_fbank_kernel(%arg0: i32, %arg1: memref<64x128xbf16, #tpu.memory_space<vmem>>, %arg2: memref<128x256xbf16, #tpu.memory_space<vmem>>, %arg3: memref<128x128xbf16, #tpu.memory_space<vmem>>, %arg4: memref<64x128xbf16, #tpu.memory_space<vmem>>) attributes {dimension_semantics = [#tpu.dimension_semantics<parallel>], iteration_bounds = array<i64: 1>, scalar_prefetch = 0 : i64, scratch_operands = 0 : i64, tpu.core_type = #tpu.core_type<tc>, window_params = [{transform_indices = @transform_0, window_bounds = array<i64: 64, 128>}, {pipeline_mode = #tpu.pipeline_mode<synchronous>, transform_indices = @transform_1, window_bounds = array<i64: 128, 256>}, {pipeline_mode = #tpu.pipeline_mode<synchronous>, transform_indices = @transform_2, window_bounds = array<i64: 128, 128>}, {transform_indices = @transform_3, window_bounds = array<i64: 64, 128>}]} {
    %c0 = arith.constant 0 : index
    %c0_0 = arith.constant 0 : index
    %0 = vector.load %arg2[%c0, %c0_0] : memref<128x256xbf16, #tpu.memory_space<vmem>>, vector<128x256xbf16>
    %c0_1 = arith.constant 0 : index
    %c0_2 = arith.constant 0 : index
    %1 = vector.load %arg3[%c0_1, %c0_2] : memref<128x128xbf16, #tpu.memory_space<vmem>>, vector<128x128xbf16>
    %c0_i32 = arith.constant 0 : i32
    %c64_i32 = arith.constant 64 : i32
    %2 = arith.muli %c0_i32, %c64_i32 : i32
    %3 = tpu.assume_multiple %2, 64 : i32
    %4 = arith.index_cast %3 : i32 to index
    %c0_3 = arith.constant 0 : index
    %5 = vector.load %arg1[%4, %c0_3] : memref<64x128xbf16, #tpu.memory_space<vmem>>, vector<64x128xbf16>
    %cst = arith.constant dense<0.000000e+00> : vector<64x256xf32>
    %6 = tpu.matmul %5, %0, %cst {dimension_numbers = #tpu.dot_dimension_numbers<[1], [0], [0], [1], [0, 0, 1, 1], [], []>} : vector<64x128xbf16>, vector<128x256xbf16>, vector<64x256xf32> -> vector<64x256xf32>
    %7 = vector.extract_strided_slice %6 {offsets = [0, 0], sizes = [64, 128], strides = [1, 1]} : vector<64x256xf32> to vector<64x128xf32>
    %8 = vector.extract_strided_slice %6 {offsets = [0, 128], sizes = [64, 128], strides = [1, 1]} : vector<64x256xf32> to vector<64x128xf32>
    %9 = arith.mulf %7, %7 : vector<64x128xf32>
    %10 = arith.mulf %8, %8 : vector<64x128xf32>
    %11 = arith.addf %9, %10 : vector<64x128xf32>
    %12 = arith.truncf %11 : vector<64x128xf32> to vector<64x128xbf16>
    %cst_4 = arith.constant dense<0.000000e+00> : vector<64x128xf32>
    %13 = tpu.matmul %12, %1, %cst_4 {dimension_numbers = #tpu.dot_dimension_numbers<[1], [0], [0], [1], [0, 0, 1, 1], [], []>} : vector<64x128xbf16>, vector<128x128xbf16>, vector<64x128xf32> -> vector<64x128xf32>
    %cst_5 = arith.constant 1.000000e-10 : f32
    %14 = vector.broadcast %cst_5 : f32 to vector<64x128xf32>
    %15 = arith.maximumf %13, %14 : vector<64x128xf32>
    %16 = math.log %15 : vector<64x128xf32>
    %17 = arith.truncf %16 : vector<64x128xf32> to vector<64x128xbf16>
    %18 = arith.index_cast %3 : i32 to index
    %c0_6 = arith.constant 0 : index
    %19 = vector.load %arg4[%18, %c0_6] : memref<64x128xbf16, #tpu.memory_space<vmem>>, vector<64x128xbf16>
    tpu.vector_store %arg4[%18, %c0_6], %17 {strides = array<i32>} : memref<64x128xbf16, #tpu.memory_space<vmem>>, vector<64x128xbf16>,
    %c1_i32 = arith.constant 1 : i32
    return
  }
  func.func @transform_0(%arg0: i32) -> (i32, i32) {
    %c0_i32 = arith.constant 0 : i32
    %c0_i32_0 = arith.constant 0 : i32
    return %arg0, %c0_i32 : i32, i32
  }
  func.func @transform_1(%arg0: i32) -> (i32, i32) {
    %c0_i32 = arith.constant 0 : i32
    %c0_i32_0 = arith.constant 0 : i32
    %c0_i32_1 = arith.constant 0 : i32
    return %c0_i32, %c0_i32_0 : i32, i32
  }
  func.func @transform_2(%arg0: i32) -> (i32, i32) {
    %c0_i32 = arith.constant 0 : i32
    %c0_i32_0 = arith.constant 0 : i32
    %c0_i32_1 = arith.constant 0 : i32
    return %c0_i32, %c0_i32_0 : i32, i32
  }
  func.func @transform_3(%arg0: i32) -> (i32, i32) {
    %c0_i32 = arith.constant 0 : i32
    %c0_i32_0 = arith.constant 0 : i32
    return %arg0, %c0_i32 : i32, i32
  }
}

</mosaic_0001>

<bundles_post_ra>
// kernel: tpu_custom_call.1
= control target key start
LH: loop header
LB: loop body
LE: loop exit
PB: predicated region body
PF: predicated region fallthrough
CT: control target
= control target key end

     0   :  { %8 = vsyncpa [#allocation3], 0  ;;  %s841_s0 = inlined_call_operand.hbm [shape: bf16[64,128], index: 0, kind: input, shape index: {}]   ;;  %s842_s1 = inlined_call_operand.hbm [shape: bf16[128,256], index: 1, kind: input, shape index: {}]   ;;  %s843_s2 = inlined_call_operand.hbm [shape: bf16[128,128], index: 2, kind: input, shape index: {}]   ;;  %s844_s3 = inlined_call_operand.hbm [shape: bf16[64,128], index: 3, kind: output, shape index: {}]  }
   0x1   :  { %9 = vsyncpa [#allocation6], 0 }
   0x2   :  { %10 = vsyncpa [#allocation4], 0  ;;  %s755_s12 = smov [#allocation5]   ;;  %s661_s16 = scalar_lea.hbm %s842_s1, 2048 }
   0x3   :  { %s28_s13 = sshll.u32 %s755_s12, 4  ;;  %p662_p0 = scmp.ne.s32.totalorder %s842_s1, %s661_s16  ;;  %s29_s13 = int_to_ptr.vmem [resolvable:$true] %s28_s13 }
   0x4   :  { %p665_p1 = scmp.lt.u32.totalorder %s661_s16, %s842_s1 }
   0x6   :  { %p667_p2 = pnand %p665_p1, %p662_p0 }
   0x8   :  { %670 = shalt.err (!%p667_p2)
}
   0x9   :  { %s671_s21 = scalar_lea.vmem %s29_s13, 2048  ;;  %p676_p4 = scmp.lt.s32.totalorder %s29_s13, %s29_s13 }
   0xa   :  { %p672_p3 = scmp.ne.s32.totalorder %s29_s13, %s671_s21  ;;  %p677_p5 = scmp.lt.s32.totalorder %s671_s21, %s671_s21 }
   0xc   :  { %p678_p6 = por %p677_p5, %p676_p4 }
   0xe   :  { %p679_p7 = pnand %p678_p6, %p672_p3 }
  0x10   :  { %682 = shalt.err (!%p679_p7)
}
  0x11   :  { %s756_s22 = smov 128   ;;  %s757_s23 = smov 8  }
  0x12   :  { %34 = dma.hbm_to_vmem [thread:$0]  %s842_s1, 2048, %s29_s13, [#allocation6], %s756_s22, %s756_s22, %s757_s23  }
  0x13   :  { %s758_s26 = smov [#allocation2]   ;;  %s683_s30 = scalar_lea.hbm %s841_s0, 512 }
  0x14   :  { %s16_s27 = sshll.u32 %s758_s26, 4  ;;  %p684_p8 = scmp.ne.s32.totalorder %s841_s0, %s683_s30  ;;  %s17_s27 = int_to_ptr.vmem [resolvable:$true] %s16_s27 }
  0x15   :  { %p687_p9 = scmp.lt.u32.totalorder %s683_s30, %s841_s0 }
  0x17   :  { %p689_p10 = pnand %p687_p9, %p684_p8 }
  0x19   :  { %692 = shalt.err (!%p689_p10)
}
  0x1a   :  { %s693_s8 = scalar_lea.vmem %s17_s27, 512  ;;  %p698_p12 = scmp.lt.s32.totalorder %s17_s27, %s17_s27 }
  0x1b   :  { %p694_p11 = scmp.ne.s32.totalorder %s17_s27, %s693_s8  ;;  %p699_p13 = scmp.lt.s32.totalorder %s693_s8, %s693_s8 }
  0x1d   :  { %p700_p0 = por %p699_p13, %p698_p12 }
  0x1f   :  { %p701_p1 = pnand %p700_p0, %p694_p11 }
  0x21   :  { %704 = shalt.err (!%p701_p1)
}
  0x22   :  { %s759_s1 = smov 64   ;;  %s760_s9 = smov 4  }
  0x23   :  { %22 = dma.hbm_to_vmem [thread:$0]  %s841_s0, 512, %s17_s27, [#allocation3], %s759_s1, %s759_s1, %s760_s9  }
  0x24   :  { %s761_s12 = smov [#allocation7]   ;;  %s705_s16 = scalar_lea.hbm %s843_s2, 1024 }
  0x25   :  { %s40_s13 = sshll.u32 %s761_s12, 4  ;;  %p706_p2 = scmp.ne.s32.totalorder %s843_s2, %s705_s16  ;;  %s41_s13 = int_to_ptr.vmem [resolvable:$true] %s40_s13 }
  0x26   :  { %p709_p3 = scmp.lt.u32.totalorder %s705_s16, %s843_s2 }
  0x28   :  { %p711_p4 = pnand %p709_p3, %p706_p2 }
  0x2a   :  { %714 = shalt.err (!%p711_p4)
}
  0x2b   :  { %s715_s21 = scalar_lea.vmem %s41_s13, 1024  ;;  %p720_p6 = scmp.lt.s32.totalorder %s41_s13, %s41_s13 }
  0x2c   :  { %p716_p5 = scmp.ne.s32.totalorder %s41_s13, %s715_s21  ;;  %p721_p7 = scmp.lt.s32.totalorder %s715_s21, %s715_s21 }
  0x2e   :  { %p722_p8 = por %p721_p7, %p720_p6 }
  0x30   :  { %p723_p9 = pnand %p722_p8, %p716_p5 }
  0x32   :  { %726 = shalt.err (!%p723_p9)
}
  0x33   :  { %46 = dma.hbm_to_vmem [thread:$0]  %s843_s2, 1024, %s41_s13, [#allocation6], %s759_s1, %s759_s1, %s760_s9  }
  0x34   :  { %749 = dma.done.wait [#allocation3], 512  }
  0x35   :  { %750 = vsyncadd [#allocation3], 4294966784 }
  0x36   :  { %751 = dma.done.wait [#allocation6], 3072  }
  0x37   :  { %752 = vsyncadd [#allocation6], 4294964224  ;;  %v762_v0 = vmov 0   ;;  %v609_v1 = vld [vmem:[#allocation5 + $0x4] ss:$8 sps:$4 sm:$0xff]   ;;  %v639_v16 = vld [vmem:[#allocation7 + $0x10] sm:$0xff]  }
  0x38   :  { %233 = vmatprep.mubr.bf16.mxu0 %v762_v0  ;;  %v611_v2 = vld [vmem:[#allocation5] ss:$8 sps:$4 sm:$0xff]   ;;  %201 = vmatprep.subr.bf16.mxu0 %v609_v1  ;;  %v612_v3 = vld [vmem:[#allocation5 + $0x14] ss:$8 sps:$4 sm:$0xff]   ;;  %v614_v4 = vld [vmem:[#allocation5 + $0x10] ss:$8 sps:$4 sm:$0xff]  }
  0x39   :  { %202 = vmatpush1.bf16.msra.mxu0 %v611_v2  ;;  %v615_v5 = vld [vmem:[#allocation5 + $0x24] ss:$8 sps:$4 sm:$0xff]   ;;  %v617_v6 = vld [vmem:[#allocation5 + $0x20] ss:$8 sps:$4 sm:$0xff]   ;;  %v618_v7 = vld [vmem:[#allocation5 + $0x34] ss:$8 sps:$4 sm:$0xff]  }
  0x3a   :  { %203 = vmatprep.subr.bf16.mxu0 %v612_v3  ;;  %v620_v8 = vld [vmem:[#allocation5 + $0x30] ss:$8 sps:$4 sm:$0xff]   ;;  %v621_v9 = vld [vmem:[#allocation5 + $0x44] ss:$8 sps:$4 sm:$0xff]   ;;  %v623_v10 = vld [vmem:[#allocation5 + $0x40] ss:$8 sps:$4 sm:$0xff]  }
  0x3b   :  { %v624_v11 = vld [vmem:[#allocation5 + $0x54] ss:$8 sps:$4 sm:$0xff]   ;;  %v637_v12 = vld [vmem:[#allocation7] sm:$0xff]   ;;  %v638_v13 = vld [vmem:[#allocation7 + $0x8] sm:$0xff]   ;;  %s763_s2 = smov [#allocation8]  }
  0x3c   :  { %v626_v14 = vld [vmem:[#allocation5 + $0x50] ss:$8 sps:$4 sm:$0xff]   ;;  %576 = vmatprep.subr.bf16.mxu1 %v637_v12  ;;  %v627_v15 = vld [vmem:[#allocation5 + $0x64] ss:$8 sps:$4 sm:$0xff]   ;;  %v629_v17 = vld [vmem:[#allocation5 + $0x60] ss:$8 sps:$4 sm:$0xff]  }
  0x3d   :  { %204 = vmatpush1.bf16.msra.mxu0 %v614_v4  ;;  %577 = vmatpush3.bf16.msra.mxu1 %v637_v12  ;;  %v640_v18 = vld [vmem:[#allocation7 + $0x18] sm:$0xff]   ;;  %v633_v21 = vld [vmem:[#allocation2] sm:$0xff]   ;;  %v634_v22 = vld [vmem:[#allocation2 + $0x8] sm:$0xff]   ;;  %s484_s23 = sshll.u32 %s763_s2, 4  ;;  %s485_s23 = int_to_ptr.vmem [resolvable:$true] %s484_s23 }
  0x3e   :  { %205 = vmatprep.subr.bf16.mxu0 %v615_v5  ;;  %578 = vmatprep.subr.bf16.mxu1 %v638_v13  ;;  %v630_v19 = vld [vmem:[#allocation5 + $0x74] ss:$8 sps:$4 sm:$0xff]   ;;  %v632_v20 = vld [vmem:[#allocation5 + $0x70] ss:$8 sps:$4 sm:$0xff]   ;;  %v641_v25 = vld [vmem:[#allocation7 + $0x20] sm:$0xff]   ;;  %s727_s24 = scalar_lea.vmem %s485_s23, 512  ;;  %p732_p11 = scmp.lt.s32.totalorder %s485_s23, %s485_s23 }
  0x3f   :  { %v635_v23 = vld [vmem:[#allocation2 + $0x10] sm:$0xff]   ;;  %v636_v24 = vld [vmem:[#allocation2 + $0x18] sm:$0xff]   ;;  %v642_v26 = vld [vmem:[#allocation7 + $0x28] sm:$0xff]   ;;  %p728_p10 = scmp.ne.s32.totalorder %s485_s23, %s727_s24  ;;  %p733_p12 = scmp.lt.s32.totalorder %s727_s24, %s727_s24 }
  0x40   :  { %v643_v27 = vld [vmem:[#allocation7 + $0x30] sm:$0xff]   ;;  %v644_v28 = vld [vmem:[#allocation7 + $0x38] sm:$0xff]  }
  0x41   :  { %206 = vmatpush1.bf16.msra.mxu0 %v617_v6  ;;  %579 = vmatpush3.bf16.msra.mxu1 %v638_v13  ;;  %p734_p13 = por %p733_p12, %p732_p11 }
  0x42   :  { %207 = vmatprep.subr.bf16.mxu0 %v618_v7  ;;  %580 = vmatprep.subr.bf16.mxu1 %v639_v16 }
  0x43   :  { %p735_p0 = pnand %p734_p13, %p728_p10 }
  0x45   :  { %208 = vmatpush1.bf16.msra.mxu0 %v620_v8  ;;  %581 = vmatpush3.bf16.msra.mxu1 %v639_v16 }
  0x46   :  { %209 = vmatprep.subr.bf16.mxu0 %v621_v9  ;;  %582 = vmatprep.subr.bf16.mxu1 %v640_v18 }
  0x49   :  { %210 = vmatpush1.bf16.msra.mxu0 %v623_v10  ;;  %583 = vmatpush3.bf16.msra.mxu1 %v640_v18 }
  0x4a   :  { %211 = vmatprep.subr.bf16.mxu0 %v624_v11  ;;  %584 = vmatprep.subr.bf16.mxu1 %v641_v25 }
  0x4d   :  { %212 = vmatpush1.bf16.msra.mxu0 %v626_v14  ;;  %585 = vmatpush3.bf16.msra.mxu1 %v641_v25 }
  0x4e   :  { %213 = vmatprep.subr.bf16.mxu0 %v627_v15  ;;  %586 = vmatprep.subr.bf16.mxu1 %v642_v26 }
  0x51   :  { %214 = vmatpush1.bf16.msra.mxu0 %v629_v17  ;;  %587 = vmatpush3.bf16.msra.mxu1 %v642_v26 }
  0x52   :  { %215 = vmatprep.subr.bf16.mxu0 %v630_v19  ;;  %588 = vmatprep.subr.bf16.mxu1 %v643_v27 }
  0x55   :  { %216 = vmatpush1.bf16.msra.mxu0 %v632_v20  ;;  %589 = vmatpush3.bf16.msra.mxu1 %v643_v27 }
  0x56   :  { %590 = vmatprep.subr.bf16.mxu1 %v644_v28 }
  0x58   :  { %234 = vmatmul.mubr.bf16.vlgmr.msra.gmra.mrb[0].mxu0 %v633_v21 }
  0x59   :  { %243 = vmatprep.mubr.bf16.mxu0 %v762_v0  ;;  %591 = vmatpush3.bf16.msra.mxu1 %v644_v28 }
  0x60   :  { %244 = vmatmul.mubr.bf16.gmra.mrb[4].mxu0 %v634_v22 }
  0x61   :  { %253 = vmatprep.mubr.bf16.mxu0 %v762_v0 }
  0x68   :  { %254 = vmatmul.mubr.bf16.gmra.mrb[8].mxu0 %v635_v23 }
  0x69   :  { %263 = vmatprep.mubr.bf16.mxu0 %v762_v0 }
  0x70   :  { %264 = vmatmul.mubr.bf16.gmra.mrb[12].mxu0 %v636_v24 }
 0x12b   :  { %v235_v29 = vpop.f32.mrb[0].mxu0 }
 0x12c   :  { %v274_v30 = vmul.f32 %v235_v29, %v235_v29  ;;  %v237_v31 = vpop.f32.mrb[1].mxu0 }
 0x12d   :  { %v282_v32 = vmul.f32 %v237_v31, %v237_v31  ;;  %v239_v33 = vpop.f32.mrb[2].mxu0 }
 0x12e   :  { %v275_v34 = vmul.f32 %v239_v33, %v239_v33  ;;  %v241_v35 = vpop.f32.mrb[3].mxu0 }
 0x12f   :  { %v283_v36 = vmul.f32 %v241_v35, %v241_v35  ;;  %v290_v37 = vadd.f32 %v282_v32, %v274_v30 }
 0x131   :  { %v291_v38 = vadd.f32 %v283_v36, %v275_v34 }
 0x133   :  { %v245_v39 = vpop.f32.mrb[4].mxu0  ;;  %v298_v40 = vpack.c.bf16 %v291_v38, %v290_v37 }
 0x134   :  { %v276_v41 = vmul.f32 %v245_v39, %v245_v39  ;;  %v247_v42 = vpop.f32.mrb[5].mxu0 }
 0x135   :  { %v284_v43 = vmul.f32 %v247_v42, %v247_v42  ;;  %v249_v44 = vpop.f32.mrb[6].mxu0  ;;  %592 = vmatprep.mubr.bf16.mxu1 %v298_v40 }
 0x136   :  { %v277_v45 = vmul.f32 %v249_v44, %v249_v44  ;;  %v251_v46 = vpop.f32.mrb[7].mxu0 }
 0x137   :  { %v292_v47 = vadd.f32 %v284_v43, %v276_v41  ;;  %v285_v48 = vmul.f32 %v251_v46, %v251_v46 }
 0x139   :  { %v293_v49 = vadd.f32 %v285_v48, %v277_v45 }
 0x13b   :  { %v255_v50 = vpop.f32.mrb[8].mxu0  ;;  %v299_v51 = vpack.c.bf16 %v293_v49, %v292_v47 }
 0x13c   :  { %v278_v52 = vmul.f32 %v255_v50, %v255_v50  ;;  %v257_v53 = vpop.f32.mrb[9].mxu0 }
 0x13d   :  { %v286_v54 = vmul.f32 %v257_v53, %v257_v53  ;;  %v259_v55 = vpop.f32.mrb[10].mxu0  ;;  %593 = vmatmul.mubr.bf16.vlgmr.msra.gmra.mrb[0].mxu1 %v299_v51 }
 0x13e   :  { %v279_v56 = vmul.f32 %v259_v55, %v259_v55  ;;  %v261_v57 = vpop.f32.mrb[11].mxu0 }
 0x13f   :  { %v294_v58 = vadd.f32 %v286_v54, %v278_v52  ;;  %v287_v59 = vmul.f32 %v261_v57, %v261_v57 }
 0x141   :  { %v295_v60 = vadd.f32 %v287_v59, %v279_v56 }
 0x143   :  { %v265_v61 = vpop.f32.mrb[12].mxu0  ;;  %v300_v62 = vpack.c.bf16 %v295_v60, %v294_v58 }
 0x144   :  { %v280_v63 = vmul.f32 %v265_v61, %v265_v61  ;;  %v267_v0 = vpop.f32.mrb[13].mxu0 }
 0x145   :  { %v288_v1 = vmul.f32 %v267_v0, %v267_v0  ;;  %v269_v2 = vpop.f32.mrb[14].mxu0  ;;  %596 = vmatprep.mubr.bf16.mxu1 %v300_v62 }
 0x146   :  { %v281_v3 = vmul.f32 %v269_v2, %v269_v2  ;;  %v271_v4 = vpop.f32.mrb[15].mxu0 }
 0x147   :  { %v296_v5 = vadd.f32 %v288_v1, %v280_v63  ;;  %v289_v6 = vmul.f32 %v271_v4, %v271_v4 }
 0x149   :  { %v297_v7 = vadd.f32 %v289_v6, %v281_v3 }
 0x14b   :  { %v301_v8 = vpack.c.bf16 %v297_v7, %v296_v5 }
 0x14d   :  { %597 = vmatmul.mubr.bf16.gmra.mrb[4].mxu1 %v301_v8 }
 0x210   :  { %v594_v9 = vpop.f32.mrb[0].mxu1 }
 0x211   :  { %v417_v10 = vmax.f32 %v594_v9, 1e-10  ;;  %v384_v11 = vpop.f32.mrb[1].mxu1 }
 0x212   :  { %v415_v12 = vmax.f32 %v384_v11, 1e-10  ;;  %v595_v13 = vpop.f32.mrb[2].mxu1 }
 0x213   :  { %645 = vlog2.f32 %v417_v10  ;;  %v418_v14 = vmax.f32 %v595_v13, 1e-10  ;;  %v387_v15 = vpop.f32.mrb[3].mxu1 }
 0x214   :  { %647 = vlog2.f32 %v415_v12  ;;  %v416_v16 = vmax.f32 %v387_v15, 1e-10 }
 0x215   :  { %649 = vlog2.f32 %v418_v14 }
 0x216   :  { %651 = vlog2.f32 %v416_v16 }
 0x21d   :  { %v646_v17 = vpop.eup %645 }
 0x21e   :  { %v648_v18 = vpop.eup %647  ;;  %v428_v20 = vmul.f32 0.6931472, %v646_v17 }
 0x21f   :  { %v650_v19 = vpop.eup %649  ;;  %v424_v22 = vmul.f32 0.6931472, %v648_v18 }
 0x220   :  { %v652_v21 = vpop.eup %651  ;;  %v430_v23 = vmul.f32 0.6931472, %v650_v19  ;;  %v598_v24 = vpop.f32.mrb[4].mxu1 }
 0x221   :  { %v426_v25 = vmul.f32 0.6931472, %v652_v21  ;;  %v421_v26 = vmax.f32 %v598_v24, 1e-10  ;;  %v400_v27 = vpop.f32.mrb[5].mxu1 }
 0x222   :  { %v549_v28 = vpack.c.bf16 %v430_v23, %v428_v20  ;;  %v419_v29 = vmax.f32 %v400_v27, 1e-10  ;;  %v599_v30 = vpop.f32.mrb[6].mxu1 }
 0x223   :  { %v544_v31 = vpack.c.bf16 %v426_v25, %v424_v22  ;;  %653 = vlog2.f32 %v421_v26  ;;  %v422_v32 = vmax.f32 %v599_v30, 1e-10  ;;  %v403_v33 = vpop.f32.mrb[7].mxu1 }
 0x224   :  { %561 = vst [vmem:[#allocation8 + $0x8] sm:$0xff] %v549_v28   ;;  %655 = vlog2.f32 %v419_v29  ;;  %v420_v34 = vmax.f32 %v403_v33, 1e-10 }
 0x225   :  { %545 = vst [vmem:[#allocation8] sm:$0xff] %v544_v31   ;;  %657 = vlog2.f32 %v422_v32 }
 0x226   :  { %659 = vlog2.f32 %v420_v34 }
 0x22d   :  { %v654_v35 = vpop.eup %653 }
 0x22e   :  { %v656_v36 = vpop.eup %655  ;;  %v436_v39 = vmul.f32 0.6931472, %v654_v35 }
 0x22f   :  { %v658_v37 = vpop.eup %657  ;;  %v432_v41 = vmul.f32 0.6931472, %v656_v36 }
 0x230   :  { %v660_v38 = vpop.eup %659  ;;  %v438_v40 = vmul.f32 0.6931472, %v658_v37 }
 0x231   :  { %v434_v42 = vmul.f32 0.6931472, %v660_v38 }
 0x232   :  { %v559_v43 = vpack.c.bf16 %v438_v40, %v436_v39 }
 0x233   :  { %v554_v44 = vpack.c.bf16 %v434_v42, %v432_v41 }
 0x234   :  { %563 = vst [vmem:[#allocation8 + $0x18] sm:$0xff] %v559_v43  }
 0x235   :  { %562 = vst [vmem:[#allocation8 + $0x10] sm:$0xff] %v554_v44  }
 0x236   :  { %738 = shalt.err (!%p735_p0)
}
 0x237   :  { %s739_s27 = scalar_lea.hbm %s844_s3, 512 }
 0x238   :  { %p740_p1 = scmp.ne.s32.totalorder %s844_s3, %s739_s27  ;;  %p743_p2 = scmp.lt.u32.totalorder %s739_s27, %s844_s3 }
 0x23a   :  { %p745_p3 = pnand %p743_p2, %p740_p1 }
 0x23c   :  { %748 = shalt.err (!%p745_p3)
}
 0x23d   :  { %490 = dma.vmem_to_hbm [thread:$0]  %s485_s23, 512, %s844_s3, [#allocation4], %s759_s1, %s759_s1, %s760_s9  }
 0x23e   :  { %753 = dma.done.wait [#allocation4], 512  }
 0x23f   :  { %754 = vsyncadd [#allocation4], 4294966784 }
 0x240   :  { %494 = vsyncpa [#allocation3], 1 }
 0x241   :  { %495 = vsyncpa [#allocation6], 1 }
 0x242   :  { %496 = vsyncpa [#allocation4], 1 }

// kernel: tpu_custom_call.1
= control target key start
LH: loop header
LB: loop body
LE: loop exit
PB: predicated region body
PF: predicated region fallthrough
CT: control target
= control target key end

     0   :  { %8 = vsyncpa [#allocation3], 0  ;;  %s841_s0 = inlined_call_operand.hbm [shape: bf16[64,128], index: 0, kind: input, shape index: {}]   ;;  %s842_s1 = inlined_call_operand.hbm [shape: bf16[128,256], index: 1, kind: input, shape index: {}]   ;;  %s843_s2 = inlined_call_operand.hbm [shape: bf16[128,128], index: 2, kind: input, shape index: {}]   ;;  %s844_s3 = inlined_call_operand.hbm [shape: bf16[64,128], index: 3, kind: output, shape index: {}]  }
   0x1   :  { %9 = vsyncpa [#allocation6], 0 }
   0x2   :  { %10 = vsyncpa [#allocation4], 0  ;;  %s755_s12 = smov [#allocation5]   ;;  %s661_s16 = scalar_lea.hbm %s842_s1, 2048 }
   0x3   :  { %s28_s13 = sshll.u32 %s755_s12, 4  ;;  %p662_p0 = scmp.ne.s32.totalorder %s842_s1, %s661_s16  ;;  %s29_s13 = int_to_ptr.vmem [resolvable:$true] %s28_s13 }
   0x4   :  { %p665_p1 = scmp.lt.u32.totalorder %s661_s16, %s842_s1 }
   0x6   :  { %p667_p2 = pnand %p665_p1, %p662_p0 }
   0x8   :  { %670 = shalt.err (!%p667_p2)
}
   0x9   :  { %s671_s21 = scalar_lea.vmem %s29_s13, 2048  ;;  %p676_p4 = scmp.lt.s32.totalorder %s29_s13, %s29_s13 }
   0xa   :  { %p672_p3 = scmp.ne.s32.totalorder %s29_s13, %s671_s21  ;;  %p677_p5 = scmp.lt.s32.totalorder %s671_s21, %s671_s21 }
   0xc   :  { %p678_p6 = por %p677_p5, %p676_p4 }
   0xe   :  { %p679_p7 = pnand %p678_p6, %p672_p3 }
  0x10   :  { %682 = shalt.err (!%p679_p7)
}
  0x11   :  { %s756_s22 = smov 128   ;;  %s757_s23 = smov 8  }
  0x12   :  { %34 = dma.hbm_to_vmem [thread:$0]  %s842_s1, 2048, %s29_s13, [#allocation6], %s756_s22, %s756_s22, %s757_s23  }
  0x13   :  { %s758_s26 = smov [#allocation2]   ;;  %s683_s30 = scalar_lea.hbm %s841_s0, 512 }
  0x14   :  { %s16_s27 = sshll.u32 %s758_s26, 4  ;;  %p684_p8 = scmp.ne.s32.totalorder %s841_s0, %s683_s30  ;;  %s17_s27 = int_to_ptr.vmem [resolvable:$true] %s16_s27 }
  0x15   :  { %p687_p9 = scmp.lt.u32.totalorder %s683_s30, %s841_s0 }
  0x17   :  { %p689_p10 = pnand %p687_p9, %p684_p8 }
  0x19   :  { %692 = shalt.err (!%p689_p10)
}
  0x1a   :  { %s693_s8 = scalar_lea.vmem %s17_s27, 512  ;;  %p698_p12 = scmp.lt.s32.totalorder %s17_s27, %s17_s27 }
  0x1b   :  { %p694_p11 = scmp.ne.s32.totalorder %s17_s27, %s693_s8  ;;  %p699_p13 = scmp.lt.s32.totalorder %s693_s8, %s693_s8 }
  0x1d   :  { %p700_p0 = por %p699_p13, %p698_p12 }
  0x1f   :  { %p701_p1 = pnand %p700_p0, %p694_p11 }
  0x21   :  { %704 = shalt.err (!%p701_p1)
}
  0x22   :  { %s759_s1 = smov 64   ;;  %s760_s9 = smov 4  }
  0x23   :  { %22 = dma.hbm_to_vmem [thread:$0]  %s841_s0, 512, %s17_s27, [#allocation3], %s759_s1, %s759_s1, %s760_s9  }
  0x24   :  { %s761_s12 = smov [#allocation7]   ;;  %s705_s16 = scalar_lea.hbm %s843_s2, 1024 }
  0x25   :  { %s40_s13 = sshll.u32 %s761_s12, 4  ;;  %p706_p2 = scmp.ne.s32.totalorder %s843_s2, %s705_s16  ;;  %s41_s13 = int_to_ptr.vmem [resolvable:$true] %s40_s13 }
  0x26   :  { %p709_p3 = scmp.lt.u32.totalorder %s705_s16, %s843_s2 }
  0x28   :  { %p711_p4 = pnand %p709_p3, %p706_p2 }
  0x2a   :  { %714 = shalt.err (!%p711_p4)
}
  0x2b   :  { %s715_s21 = scalar_lea.vmem %s41_s13, 1024  ;;  %p720_p6 = scmp.lt.s32.totalorder %s41_s13, %s41_s13 }
  0x2c   :  { %p716_p5 = scmp.ne.s32.totalorder %s41_s13, %s715_s21  ;;  %p721_p7 = scmp.lt.s32.totalorder %s715_s21, %s715_s21 }
  0x2e   :  { %p722_p8 = por %p721_p7, %p720_p6 }
  0x30   :  { %p723_p9 = pnand %p722_p8, %p716_p5 }
  0x32   :  { %726 = shalt.err (!%p723_p9)
}
  0x33   :  { %46 = dma.hbm_to_vmem [thread:$0]  %s843_s2, 1024, %s41_s13, [#allocation6], %s759_s1, %s759_s1, %s760_s9  }
  0x34   :  { %749 = dma.done.wait [#allocation3], 512  }
  0x35   :  { %750 = vsyncadd [#allocation3], 4294966784 }
  0x36   :  { %751 = dma.done.wait [#allocation6], 3072  }
  0x37   :  { %752 = vsyncadd [#allocation6], 4294964224  ;;  %v762_v0 = vmov 0   ;;  %v609_v1 = vld [vmem:[#allocation5 + $0x4] ss:$8 sps:$4 sm:$0xff]   ;;  %v639_v16 = vld [vmem:[#allocation7 + $0x10] sm:$0xff]  }
  0x38   :  { %233 = vmatprep.mubr.bf16.mxu0 %v762_v0  ;;  %v611_v2 = vld [vmem:[#allocation5] ss:$8 sps:$4 sm:$0xff]   ;;  %201 = vmatprep.subr.bf16.mxu0 %v609_v1  ;;  %v612_v3 = vld [vmem:[#allocation5 + $0x14] ss:$8 sps:$4 sm:$0xff]   ;;  %v614_v4 = vld [vmem:[#allocation5 + $0x10] ss:$8 sps:$4 sm:$0xff]  }
  0x39   :  { %202 = vmatpush1.bf16.msra.mxu0 %v611_v2  ;;  %v615_v5 = vld [vmem:[#allocation5 + $0x24] ss:$8 sps:$4 sm:$0xff]   ;;  %v617_v6 = vld [vmem:[#allocation5 + $0x20] ss:$8 sps:$4 sm:$0xff]   ;;  %v618_v7 = vld [vmem:[#allocation5 + $0x34] ss:$8 sps:$4 sm:$0xff]  }
  0x3a   :  { %203 = vmatprep.subr.bf16.mxu0 %v612_v3  ;;  %v620_v8 = vld [vmem:[#allocation5 + $0x30] ss:$8 sps:$4 sm:$0xff]   ;;  %v621_v9 = vld [vmem:[#allocation5 + $0x44] ss:$8 sps:$4 sm:$0xff]   ;;  %v623_v10 = vld [vmem:[#allocation5 + $0x40] ss:$8 sps:$4 sm:$0xff]  }
  0x3b   :  { %v624_v11 = vld [vmem:[#allocation5 + $0x54] ss:$8 sps:$4 sm:$0xff]   ;;  %v637_v12 = vld [vmem:[#allocation7] sm:$0xff]   ;;  %v638_v13 = vld [vmem:[#allocation7 + $0x8] sm:$0xff]   ;;  %s763_s2 = smov [#allocation8]  }
  0x3c   :  { %v626_v14 = vld [vmem:[#allocation5 + $0x50] ss:$8 sps:$4 sm:$0xff]   ;;  %576 = vmatprep.subr.bf16.mxu1 %v637_v12  ;;  %v627_v15 = vld [vmem:[#allocation5 + $0x64] ss:$8 sps:$4 sm:$0xff]   ;;  %v629_v17 = vld [vmem:[#allocation5 + $0x60] ss:$8 sps:$4 sm:$0xff]  }
  0x3d   :  { %204 = vmatpush1.bf16.msra.mxu0 %v614_v4  ;;  %577 = vmatpush3.bf16.msra.mxu1 %v637_v12  ;;  %v640_v18 = vld [vmem:[#allocation7 + $0x18] sm:$0xff]   ;;  %v633_v21 = vld [vmem:[#allocation2] sm:$0xff]   ;;  %v634_v22 = vld [vmem:[#allocation2 + $0x8] sm:$0xff]   ;;  %s484_s23 = sshll.u32 %s763_s2, 4  ;;  %s485_s23 = int_to_ptr.vmem [resolvable:$true] %s484_s23 }
  0x3e   :  { %205 = vmatprep.subr.bf16.mxu0 %v615_v5  ;;  %578 = vmatprep.subr.bf16.mxu1 %v638_v13  ;;  %v630_v19 = vld [vmem:[#allocation5 + $0x74] ss:$8 sps:$4 sm:$0xff]   ;;  %v632_v20 = vld [vmem:[#allocation5 + $0x70] ss:$8 sps:$4 sm:$0xff]   ;;  %v641_v25 = vld [vmem:[#allocation7 + $0x20] sm:$0xff]   ;;  %s727_s24 = scalar_lea.vmem %s485_s23, 512  ;;  %p732_p11 = scmp.lt.s32.totalorder %s485_s23, %s485_s23 }
  0x3f   :  { %v635_v23 = vld [vmem:[#allocation2 + $0x10] sm:$0xff]   ;;  %v636_v24 = vld [vmem:[#allocation2 + $0x18] sm:$0xff]   ;;  %v642_v26 = vld [vmem:[#allocation7 + $0x28] sm:$0xff]   ;;  %p728_p10 = scmp.ne.s32.totalorder %s485_s23, %s727_s24  ;;  %p733_p12 = scmp.lt.s32.totalorder %s727_s24, %s727_s24 }
  0x40   :  { %v643_v27 = vld [vmem:[#allocation7 + $0x30] sm:$0xff]   ;;  %v644_v28 = vld [vmem:[#allocation7 + $0x38] sm:$0xff]  }
  0x41   :  { %206 = vmatpush1.bf16.msra.mxu0 %v617_v6  ;;  %579 = vmatpush3.bf16.msra.mxu1 %v638_v13  ;;  %p734_p13 = por %p733_p12, %p732_p11 }
  0x42   :  { %207 = vmatprep.subr.bf16.mxu0 %v618_v7  ;;  %580 = vmatprep.subr.bf16.mxu1 %v639_v16 }
  0x43   :  { %p735_p0 = pnand %p734_p13, %p728_p10 }
  0x45   :  { %208 = vmatpush1.bf16.msra.mxu0 %v620_v8  ;;  %581 = vmatpush3.bf16.msra.mxu1 %v639_v16 }
  0x46   :  { %209 = vmatprep.subr.bf16.mxu0 %v621_v9  ;;  %582 = vmatprep.subr.bf16.mxu1 %v640_v18 }
  0x49   :  { %210 = vmatpush1.bf16.msra.mxu0 %v623_v10  ;;  %583 = vmatpush3.bf16.msra.mxu1 %v640_v18 }
  0x4a   :  { %211 = vmatprep.subr.bf16.mxu0 %v624_v11  ;;  %584 = vmatprep.subr.bf16.mxu1 %v641_v25 }
  0x4d   :  { %212 = vmatpush1.bf16.msra.mxu0 %v626_v14  ;;  %585 = vmatpush3.bf16.msra.mxu1 %v641_v25 }
  0x4e   :  { %213 = vmatprep.subr.bf16.mxu0 %v627_v15  ;;  %586 = vmatprep.subr.bf16.mxu1 %v642_v26 }
  0x51   :  { %214 = vmatpush1.bf16.msra.mxu0 %v629_v17  ;;  %587 = vmatpush3.bf16.msra.mxu1 %v642_v26 }
  0x52   :  { %215 = vmatprep.subr.bf16.mxu0 %v630_v19  ;;  %588 = vmatprep.subr.bf16.mxu1 %v643_v27 }
  0x55   :  { %216 = vmatpush1.bf16.msra.mxu0 %v632_v20  ;;  %589 = vmatpush3.bf16.msra.mxu1 %v643_v27 }
  0x56   :  { %590 = vmatprep.subr.bf16.mxu1 %v644_v28 }
  0x58   :  { %234 = vmatmul.mubr.bf16.vlgmr.msra.gmra.mrb[0].mxu0 %v633_v21 }
  0x59   :  { %243 = vmatprep.mubr.bf16.mxu0 %v762_v0  ;;  %591 = vmatpush3.bf16.msra.mxu1 %v644_v28 }
  0x60   :  { %244 = vmatmul.mubr.bf16.gmra.mrb[4].mxu0 %v634_v22 }
  0x61   :  { %253 = vmatprep.mubr.bf16.mxu0 %v762_v0 }
  0x68   :  { %254 = vmatmul.mubr.bf16.gmra.mrb[8].mxu0 %v635_v23 }
  0x69   :  { %263 = vmatprep.mubr.bf16.mxu0 %v762_v0 }
  0x70   :  { %264 = vmatmul.mubr.bf16.gmra.mrb[12].mxu0 %v636_v24 }
 0x12b   :  { %v235_v29 = vpop.f32.mrb[0].mxu0 }
 0x12c   :  { %v274_v30 = vmul.f32 %v235_v29, %v235_v29  ;;  %v237_v31 = vpop.f32.mrb[1].mxu0 }
 0x12d   :  { %v282_v32 = vmul.f32 %v237_v31, %v237_v31  ;;  %v239_v33 = vpop.f32.mrb[2].mxu0 }
 0x12e   :  { %v275_v34 = vmul.f32 %v239_v33, %v239_v33  ;;  %v241_v35 = vpop.f32.mrb[3].mxu0 }
 0x12f   :  { %v283_v36 = vmul.f32 %v241_v35, %v241_v35  ;;  %v290_v37 = vadd.f32 %v282_v32, %v274_v30 }
 0x131   :  { %v291_v38 = vadd.f32 %v283_v36, %v275_v34 }
 0x133   :  { %v245_v39 = vpop.f32.mrb[4].mxu0  ;;  %v298_v40 = vpack.c.bf16 %v291_v38, %v290_v37 }
 0x134   :  { %v276_v41 = vmul.f32 %v245_v39, %v245_v39  ;;  %v247_v42 = vpop.f32.mrb[5].mxu0 }
 0x135   :  { %v284_v43 = vmul.f32 %v247_v42, %v247_v42  ;;  %v249_v44 = vpop.f32.mrb[6].mxu0  ;;  %592 = vmatprep.mubr.bf16.mxu1 %v298_v40 }
 0x136   :  { %v277_v45 = vmul.f32 %v249_v44, %v249_v44  ;;  %v251_v46 = vpop.f32.mrb[7].mxu0 }
 0x137   :  { %v292_v47 = vadd.f32 %v284_v43, %v276_v41  ;;  %v285_v48 = vmul.f32 %v251_v46, %v251_v46 }
 0x139   :  { %v293_v49 = vadd.f32 %v285_v48, %v277_v45 }
 0x13b   :  { %v255_v50 = vpop.f32.mrb[8].mxu0  ;;  %v299_v51 = vpack.c.bf16 %v293_v49, %v292_v47 }
 0x13c   :  { %v278_v52 = vmul.f32 %v255_v50, %v255_v50  ;;  %v257_v53 = vpop.f32.mrb[9].mxu0 }
 0x13d   :  { %v286_v54 = vmul.f32 %v257_v53, %v257_v53  ;;  %v259_v55 = vpop.f32.mrb[10].mxu0  ;;  %593 = vmatmul.mubr.bf16.vlgmr.msra.gmra.mrb[0].mxu1 %v299_v51 }
 0x13e   :  { %v279_v56 = vmul.f32 %v259_v55, %v259_v55  ;;  %v261_v57 = vpop.f32.mrb[11].mxu0 }
 0x13f   :  { %v294_v58 = vadd.f32 %v286_v54, %v278_v52  ;;  %v287_v59 = vmul.f32 %v261_v57, %v261_v57 }
 0x141   :  { %v295_v60 = vadd.f32 %v287_v59, %v279_v56 }
 0x143   :  { %v265_v61 = vpop.f32.mrb[12].mxu0  ;;  %v300_v62 = vpack.c.bf16 %v295_v60, %v294_v58 }
 0x144   :  { %v280_v63 = vmul.f32 %v265_v61, %v265_v61  ;;  %v267_v0 = vpop.f32.mrb[13].mxu0 }
 0x145   :  { %v288_v1 = vmul.f32 %v267_v0, %v267_v0  ;;  %v269_v2 = vpop.f32.mrb[14].mxu0  ;;  %596 = vmatprep.mubr.bf16.mxu1 %v300_v62 }
 0x146   :  { %v281_v3 = vmul.f32 %v269_v2, %v269_v2  ;;  %v271_v4 = vpop.f32.mrb[15].mxu0 }
 0x147   :  { %v296_v5 = vadd.f32 %v288_v1, %v280_v63  ;;  %v289_v6 = vmul.f32 %v271_v4, %v271_v4 }
 0x149   :  { %v297_v7 = vadd.f32 %v289_v6, %v281_v3 }
 0x14b   :  { %v301_v8 = vpack.c.bf16 %v297_v7, %v296_v5 }
 0x14d   :  { %597 = vmatmul.mubr.bf16.gmra.mrb[4].mxu1 %v301_v8 }
 0x210   :  { %v594_v9 = vpop.f32.mrb[0].mxu1 }
 0x211   :  { %v417_v10 = vmax.f32 %v594_v9, 1e-10  ;;  %v384_v11 = vpop.f32.mrb[1].mxu1 }
 0x212   :  { %v415_v12 = vmax.f32 %v384_v11, 1e-10  ;;  %v595_v13 = vpop.f32.mrb[2].mxu1 }
 0x213   :  { %645 = vlog2.f32 %v417_v10  ;;  %v418_v14 = vmax.f32 %v595_v13, 1e-10  ;;  %v387_v15 = vpop.f32.mrb[3].mxu1 }
 0x214   :  { %647 = vlog2.f32 %v415_v12  ;;  %v416_v16 = vmax.f32 %v387_v15, 1e-10 }
 0x215   :  { %649 = vlog2.f32 %v418_v14 }
 0x216   :  { %651 = vlog2.f32 %v416_v16 }
 0x21d   :  { %v646_v17 = vpop.eup %645 }
 0x21e   :  { %v648_v18 = vpop.eup %647  ;;  %v428_v20 = vmul.f32 0.6931472, %v646_v17 }
 0x21f   :  { %v650_v19 = vpop.eup %649  ;;  %v424_v22 = vmul.f32 0.6931472, %v648_v18 }
 0x220   :  { %v652_v21 = vpop.eup %651  ;;  %v430_v23 = vmul.f32 0.6931472, %v650_v19  ;;  %v598_v24 = vpop.f32.mrb[4].mxu1 }
 0x221   :  { %v426_v25 = vmul.f32 0.6931472, %v652_v21  ;;  %v421_v26 = vmax.f32 %v598_v24, 1e-10  ;;  %v400_v27 = vpop.f32.mrb[5].mxu1 }
 0x222   :  { %v549_v28 = vpack.c.bf16 %v430_v23, %v428_v20  ;;  %v419_v29 = vmax.f32 %v400_v27, 1e-10  ;;  %v599_v30 = vpop.f32.mrb[6].mxu1 }
 0x223   :  { %v544_v31 = vpack.c.bf16 %v426_v25, %v424_v22  ;;  %653 = vlog2.f32 %v421_v26  ;;  %v422_v32 = vmax.f32 %v599_v30, 1e-10  ;;  %v403_v33 = vpop.f32.mrb[7].mxu1 }
 0x224   :  { %561 = vst [vmem:[#allocation8 + $0x8] sm:$0xff] %v549_v28   ;;  %655 = vlog2.f32 %v419_v29  ;;  %v420_v34 = vmax.f32 %v403_v33, 1e-10 }
 0x225   :  { %545 = vst [vmem:[#allocation8] sm:$0xff] %v544_v31   ;;  %657 = vlog2.f32 %v422_v32 }
 0x226   :  { %659 = vlog2.f32 %v420_v34 }
 0x22d   :  { %v654_v35 = vpop.eup %653 }
 0x22e   :  { %v656_v36 = vpop.eup %655  ;;  %v436_v39 = vmul.f32 0.6931472, %v654_v35 }
 0x22f   :  { %v658_v37 = vpop.eup %657  ;;  %v432_v41 = vmul.f32 0.6931472, %v656_v36 }
 0x230   :  { %v660_v38 = vpop.eup %659  ;;  %v438_v40 = vmul.f32 0.6931472, %v658_v37 }
 0x231   :  { %v434_v42 = vmul.f32 0.6931472, %v660_v38 }
 0x232   :  { %v559_v43 = vpack.c.bf16 %v438_v40, %v436_v39 }
 0x233   :  { %v554_v44 = vpack.c.bf16 %v434_v42, %v432_v41 }
 0x234   :  { %563 = vst [vmem:[#allocation8 + $0x18] sm:$0xff] %v559_v43  }
 0x235   :  { %562 = vst [vmem:[#allocation8 + $0x10] sm:$0xff] %v554_v44  }
 0x236   :  { %738 = shalt.err (!%p735_p0)
}
 0x237   :  { %s739_s27 = scalar_lea.hbm %s844_s3, 512 }
 0x238   :  { %p740_p1 = scmp.ne.s32.totalorder %s844_s3, %s739_s27  ;;  %p743_p2 = scmp.lt.u32.totalorder %s739_s27, %s844_s3 }
 0x23a   :  { %p745_p3 = pnand %p743_p2, %p740_p1 }
 0x23c   :  { %748 = shalt.err (!%p745_p3)
}
 0x23d   :  { %490 = dma.vmem_to_hbm [thread:$0]  %s485_s23, 512, %s844_s3, [#allocation4], %s759_s1, %s759_s1, %s760_s9  }
 0x23e   :  { %753 = dma.done.wait [#allocation4], 512  }
 0x23f   :  { %754 = vsyncadd [#allocation4], 4294966784 }
 0x240   :  { %494 = vsyncpa [#allocation3], 1 }
 0x241   :  { %495 = vsyncpa [#allocation6], 1 }
 0x242   :  { %496 = vsyncpa [#allocation4], 1 }

</bundles_post_ra>
